<compile_context>
chip_gen: v7x
topology: tpu7x:2x2x1
jax: 0.10.0
libtpu: 0.0.40
codegen_flags: <defaults>
</compile_context>

<pallas_src>
import functools

import jax
import jax.numpy as jnp
from jax.experimental import pallas as pl
from jax.experimental.pallas import tpu as pltpu


def _round_up(x: int, m: int) -> int:
    return (x + m - 1) // m * m


def _patch_embed_kernel(x_ref, w_ref, b_ref, o_ref):
    # x_ref: (tm, Kp) bf16 patch rows; w_ref: (Kp, Ep) bf16 (VMEM-resident);
    # b_ref: (1, Ep) f32; o_ref: (tm, Ep) out dtype.
    acc = jnp.dot(x_ref[...], w_ref[...], preferred_element_type=jnp.float32)
    o_ref[...] = (acc + b_ref[...]).astype(o_ref.dtype)


def _pick_tm(m, kp, ep, out_bytes, *, budget_bytes=28 * 1024 * 1024, tm_cap=2048):
    """Largest M tile whose pipeline footprint fits a VMEM budget that is safe
    on every TPU generation (v7x has only 64 MiB per TensorCore)."""
    # Per-row bytes: patches (2 bufs, bf16) + output (2 bufs) + f32 acc temp.
    per_row = 2 * kp * 2 + 2 * ep * out_bytes + ep * 4
    # Resident blocks: weight + bias (default pipeline keeps 2 buffers each).
    fixed = 2 * (kp * ep * 2) + 2 * (ep * 4)
    avail = max(budget_bytes - fixed, 16 * per_row)
    tm = int(min(tm_cap, avail // per_row))
    tm = max(16, (tm // 16) * 16)          # bf16 packs 16 rows per sublane group
    if tm >= m:
        return m                           # single block; full-dim blocks are always legal
    min_steps = 8                          # >= 4 steps per core under v7x megacore
    if m >= min_steps * 128:
        tm = min(tm, _round_up(-(-m // min_steps), 16))
    return max(16, (tm // 16) * 16)


def patch_embedding(x_nchw, weight, bias, patch_size, *, out_dtype=jnp.bfloat16):
    """PatchEmbedding.forward: (B, C, H, W) -> (B, num_patches, E).

    weight: (E, C, p, p) Conv2d OIHW kernel, bias: (E,). The matmul runs with
    bf16 operands on the MXU and f32 accumulation; out_dtype defaults to bf16
    (explicit, documented reduced-precision choice).
    """
    B, C, H, W = x_nchw.shape
    E = weight.shape[0]
    p = patch_size
    gh, gw = H // p, W // p
    num_patches = gh * gw
    K = C * p * p
    M = B * num_patches

    # Patch extraction: one XLA transpose fused with the bf16 convert.
    # (C, kh, kw) flatten order matches the OIHW weight flatten below.
    patches = x_nchw.reshape(B, C, gh, p, gw, p)
    patches = patches.transpose(0, 2, 4, 1, 3, 5).reshape(M, K)
    w_mat = weight.reshape(E, K).T                       # (K, E)

    # Zero-pad K / E to full 128-lane tiles (numerically exact; no-op at 768).
    Kp = _round_up(K, 128)
    Ep = _round_up(E, 128)
    if Kp != K:
        patches = jnp.pad(patches, ((0, 0), (0, Kp - K)))
        w_mat = jnp.pad(w_mat, ((0, Kp - K), (0, 0)))
    if Ep != E:
        w_mat = jnp.pad(w_mat, ((0, 0), (0, Ep - E)))
        bias = jnp.pad(bias, (0, Ep - E))

    patches = patches.astype(jnp.bfloat16)
    w_mat = w_mat.astype(jnp.bfloat16)
    b_mat = bias.astype(jnp.float32).reshape(1, Ep)

    out_bytes = jnp.dtype(out_dtype).itemsize
    tm = _pick_tm(M, Kp, Ep, out_bytes)
    grid = (pl.cdiv(M, tm),)     # no M padding: ragged last block is masked

    cost = pl.CostEstimate(
        flops=2 * M * Kp * Ep,
        transcendentals=0,
        bytes_accessed=(2 * M * Kp + 2 * Kp * Ep + 4 * Ep + M * Ep * out_bytes),
    )

    out = pl.pallas_call(
        _patch_embed_kernel,
        out_shape=jax.ShapeDtypeStruct((M, Ep), out_dtype),
        grid_spec=pl.GridSpec(
            grid=grid,
            in_specs=[
                # Patch rows: pipelined (double-buffered) over the M tiles.
                pl.BlockSpec((tm, Kp), lambda i: (i, 0)),
                # Weight / bias: constant block index -> stay VMEM-resident.
                # (pl.Buffered(1) would drop their second buffer, ~Kp*Ep*2 B;
                #  left at the default since the footprint already clears every
                #  generation's budget on this toolchain.)
                pl.BlockSpec((Kp, Ep), lambda i: (0, 0)),
                pl.BlockSpec((1, Ep), lambda i: (0, 0)),
            ],
            out_specs=pl.BlockSpec((tm, Ep), lambda i: (i, 0)),
        ),
        compiler_params=pltpu.CompilerParams(
            # Independent M tiles -> v7x megacore shards them (free on v5e/v6e).
            dimension_semantics=("parallel",),
            # Safe everywhere: < v7x's 64 MiB physical per-TC VMEM, and well
            # above the ~21 MiB footprint at ViT-B shapes with tm=2048.
            vmem_limit_bytes=48 * 1024 * 1024,
        ),
        cost_estimate=cost,
    )(patches, w_mat, b_mat)

    if Ep != E:
        out = out[:, :E]          # only for non-128-aligned embedding dims
    return out.reshape(B, num_patches, E)


if __name__ == "__main__":
    # Small config consistent with the module: image 16x16, patch 4, C=4, E=32.
    image_size, patch_size, in_channels, embedding_dim = 16, 4, 4, 32
    B = 2

    key = jax.random.PRNGKey(0)
    kx, kw, kb = jax.random.split(key, 3)
    x = jax.random.normal(kx, (B, in_channels, image_size, image_size), jnp.float32)
    weight = jax.random.normal(
        kw, (embedding_dim, in_channels, patch_size, patch_size), jnp.float32) * 0.02
    bias = jax.random.normal(kb, (embedding_dim,), jnp.float32) * 0.02

    fn = jax.jit(functools.partial(patch_embedding, patch_size=patch_size))
    out = jax.block_until_ready(fn(x, weight, bias))

    # Reference: lax conv with PyTorch Conv2d semantics (NCHW, OIHW), f32.
    ref = jax.lax.conv_general_dilated(
        x, weight, window_strides=(patch_size, patch_size), padding="VALID",
        dimension_numbers=("NCHW", "OIHW", "NCHW")) + bias[None, :, None, None]
    ref = ref.reshape(B, embedding_dim, -1).transpose(0, 2, 1)  # flatten(2).transpose(1,2)

    n_patches = (image_size // patch_size) ** 2
    assert out.shape == ref.shape == (B, n_patches, embedding_dim)
    assert out.dtype == jnp.bfloat16
    # bf16 MXU operands and bf16 output -> loose tolerance (accumulation is f32).
    err = float(jnp.max(jnp.abs(out.astype(jnp.float32) - ref)))
    assert jnp.allclose(out.astype(jnp.float32), ref, atol=2.5e-2, rtol=2.5e-2), err

    print("KERNEL_OK")
</pallas_src>

<mosaic_0001>
module attributes {stable_mosaic.version = 11 : i64} {
  func.func @_patch_embed_kernel(%arg0: i32, %arg1: memref<32x128xbf16, #tpu.memory_space<vmem>>, %arg2: memref<128x128xbf16, #tpu.memory_space<vmem>>, %arg3: memref<1x128xf32, #tpu.memory_space<vmem>>, %arg4: memref<32x128xbf16, #tpu.memory_space<vmem>>) attributes {dimension_semantics = [#tpu.dimension_semantics<parallel>], iteration_bounds = array<i64: 1>, scalar_prefetch = 0 : i64, scratch_operands = 0 : i64, tpu.core_type = #tpu.core_type<tc>, window_params = [{transform_indices = @transform_0, window_bounds = array<i64: 32, 128>}, {pipeline_mode = #tpu.pipeline_mode<synchronous>, transform_indices = @transform_1, window_bounds = array<i64: 128, 128>}, {pipeline_mode = #tpu.pipeline_mode<synchronous>, transform_indices = @transform_2, window_bounds = array<i64: 1, 128>}, {transform_indices = @transform_3, window_bounds = array<i64: 32, 128>}]} {
    %c0 = arith.constant 0 : index
    %c0_0 = arith.constant 0 : index
    %0 = vector.load %arg1[%c0, %c0_0] : memref<32x128xbf16, #tpu.memory_space<vmem>>, vector<32x128xbf16>
    %c0_1 = arith.constant 0 : index
    %c0_2 = arith.constant 0 : index
    %1 = vector.load %arg2[%c0_1, %c0_2] : memref<128x128xbf16, #tpu.memory_space<vmem>>, vector<128x128xbf16>
    %cst = arith.constant dense<0.000000e+00> : vector<32x128xf32>
    %2 = tpu.matmul %0, %1, %cst {dimension_numbers = #tpu.dot_dimension_numbers<[1], [0], [0], [1], [0, 0, 1, 1], [], []>} : vector<32x128xbf16>, vector<128x128xbf16>, vector<32x128xf32> -> vector<32x128xf32>
    %c0_3 = arith.constant 0 : index
    %c0_4 = arith.constant 0 : index
    %3 = vector.load %arg3[%c0_3, %c0_4] : memref<1x128xf32, #tpu.memory_space<vmem>>, vector<1x128xf32>
    %4 = vector.broadcast %3 : vector<1x128xf32> to vector<32x128xf32>
    %5 = arith.addf %2, %4 : vector<32x128xf32>
    %6 = arith.truncf %5 : vector<32x128xf32> to vector<32x128xbf16>
    %c0_5 = arith.constant 0 : index
    %c0_6 = arith.constant 0 : index
    %7 = vector.load %arg4[%c0_5, %c0_6] : memref<32x128xbf16, #tpu.memory_space<vmem>>, vector<32x128xbf16>
    tpu.vector_store %arg4[%c0_5, %c0_6], %6 {strides = array<i32>} : memref<32x128xbf16, #tpu.memory_space<vmem>>, vector<32x128xbf16>,
    return
  }
  func.func @transform_0(%arg0: i32) -> (i32, i32) {
    %c0_i32 = arith.constant 0 : i32
    %c0_i32_0 = arith.constant 0 : i32
    return %arg0, %c0_i32 : i32, i32
  }
  func.func @transform_1(%arg0: i32) -> (i32, i32) {
    %c0_i32 = arith.constant 0 : i32
    %c0_i32_0 = arith.constant 0 : i32
    %c0_i32_1 = arith.constant 0 : i32
    return %c0_i32, %c0_i32_0 : i32, i32
  }
  func.func @transform_2(%arg0: i32) -> (i32, i32) {
    %c0_i32 = arith.constant 0 : i32
    %c0_i32_0 = arith.constant 0 : i32
    %c0_i32_1 = arith.constant 0 : i32
    return %c0_i32, %c0_i32_0 : i32, i32
  }
  func.func @transform_3(%arg0: i32) -> (i32, i32) {
    %c0_i32 = arith.constant 0 : i32
    %c0_i32_0 = arith.constant 0 : i32
    return %arg0, %c0_i32 : i32, i32
  }
}

</mosaic_0001>

<bundles_post_ra>
// kernel: patch_embedding.1
= control target key start
LH: loop header
LB: loop body
LE: loop exit
PB: predicated region body
PF: predicated region fallthrough
CT: control target
= control target key end

     0   :  { %s353_s0 = inlined_call_operand.vmem [shape: bf16[32,128], index: 0, kind: input, shape index: {}]   ;;  %s354_s1 = inlined_call_operand.vmem [shape: bf16[128,128], index: 1, kind: input, shape index: {}]   ;;  %s355_s2 = inlined_call_operand.vmem [shape: f32[1,128], index: 2, kind: input, shape index: {}]   ;;  %s356_s3 = inlined_call_operand.hbm [shape: bf16[32,128], index: 3, kind: output, shape index: {}]  }
   0x1   :  { %v251_v0 = vld [vmem:[%s354_s1] sm:$0xff]   ;;  %v252_v1 = vld [vmem:[%s354_s1 + $0x8] sm:$0xff]   ;;  %v253_v2 = vld [vmem:[%s354_s1 + $0x10] sm:$0xff]  }
   0x2   :  { %228 = vmatprep.subr.bf16.mxu0 %v251_v0  ;;  %v254_v3 = vld [vmem:[%s354_s1 + $0x18] sm:$0xff]   ;;  %v259_v4 = vld [vmem:[%s353_s0] sm:$0xff]  }
   0x3   :  { %229 = vmatpush3.bf16.msra.mxu0 %v251_v0  ;;  %244 = vmatprep.mubr.bf16.mxu0 %v259_v4 }
   0x4   :  { %230 = vmatprep.subr.bf16.mxu0 %v252_v1 }
   0x7   :  { %231 = vmatpush3.bf16.msra.mxu0 %v252_v1 }
   0x8   :  { %232 = vmatprep.subr.bf16.mxu0 %v253_v2 }
   0x9   :  { %8 = vsyncpa [#allocation3], 0  ;;  %v255_v5 = vld [vmem:[%s354_s1 + $0x20] sm:$0xff]   ;;  %v256_v6 = vld [vmem:[%s354_s1 + $0x28] sm:$0xff]   ;;  %s285_s7 = smov [#allocation2]  }
   0xa   :  { %v257_v7 = vld [vmem:[%s354_s1 + $0x30] sm:$0xff]   ;;  %v258_v8 = vld [vmem:[%s354_s1 + $0x38] sm:$0xff]   ;;  %v260_v9 = vld [vmem:[%s353_s0 + $0x8] sm:$0xff]   ;;  %s177_s8 = sshll.u32 %s285_s7, 4  ;;  %s178_s8 = int_to_ptr.vmem [resolvable:$true] %s177_s8 }
   0xb   :  { %233 = vmatpush3.bf16.msra.mxu0 %v253_v2  ;;  %v188_v11 = vld [vmem:[%s355_s2] ss:$0 sm:$0xff]  ;;  %s261_s0 = scalar_lea.vmem %s178_s8, 256  ;;  %p266_p1 = scmp.lt.s32.totalorder %s178_s8, %s178_s8 }
   0xc   :  { %234 = vmatprep.subr.bf16.mxu0 %v254_v3  ;;  %p262_p0 = scmp.ne.s32.totalorder %s178_s8, %s261_s0  ;;  %p267_p2 = scmp.lt.s32.totalorder %s261_s0, %s261_s0 }
   0xe   :  { %p268_p3 = por %p267_p2, %p266_p1 }
   0xf   :  { %235 = vmatpush3.bf16.msra.mxu0 %v254_v3 }
  0x10   :  { %236 = vmatprep.subr.bf16.mxu0 %v255_v5  ;;  %p269_p4 = pnand %p268_p3, %p262_p0 }
  0x13   :  { %237 = vmatpush3.bf16.msra.mxu0 %v255_v5 }
  0x14   :  { %238 = vmatprep.subr.bf16.mxu0 %v256_v6 }
  0x17   :  { %239 = vmatpush3.bf16.msra.mxu0 %v256_v6 }
  0x18   :  { %240 = vmatprep.subr.bf16.mxu0 %v257_v7 }
  0x1b   :  { %241 = vmatpush3.bf16.msra.mxu0 %v257_v7 }
  0x1c   :  { %242 = vmatprep.subr.bf16.mxu0 %v258_v8 }
  0x1f   :  { %243 = vmatpush3.bf16.msra.mxu0 %v258_v8 }
  0x22   :  { %245 = vmatmul.mubr.bf16.vlgmr.msra.gmra.mrb[0].mxu0 %v260_v9 }
  0xf5   :  { %v246_v10 = vpop.f32.mrb[0].mxu0 }
  0xf6   :  { %v137_v12 = vpop.f32.mrb[1].mxu0  ;;  %v146_v14 = vadd.f32 %v246_v10, %v188_v11 }
  0xf7   :  { %v247_v13 = vpop.f32.mrb[2].mxu0  ;;  %v138_v17 = vadd.f32 %v188_v11, %v137_v12 }
  0xf8   :  { %v149_v15 = vadd.f32 %v247_v13, %v188_v11  ;;  %v140_v16 = vpop.f32.mrb[3].mxu0 }
  0xf9   :  { %v141_v18 = vadd.f32 %v188_v11, %v140_v16 }
  0xfa   :  { %v215_v19 = vpack.c.bf16 %v149_v15, %v146_v14 }
  0xfb   :  { %v210_v20 = vpack.c.bf16 %v141_v18, %v138_v17 }
  0xfc   :  { %217 = vst [vmem:[#allocation2 + $0x8] sm:$0xff] %v215_v19  }
  0xfd   :  { %211 = vst [vmem:[#allocation2] sm:$0xff] %v210_v20  }
  0xfe   :  { %272 = shalt.err (!%p269_p4)
}
  0xff   :  { %s273_s9 = scalar_lea.hbm %s356_s3, 256 }
 0x100   :  { %p274_p5 = scmp.ne.s32.totalorder %s356_s3, %s273_s9  ;;  %p277_p6 = scmp.lt.u32.totalorder %s273_s9, %s356_s3 }
 0x102   :  { %p279_p7 = pnand %p277_p6, %p274_p5 }
 0x104   :  { %282 = shalt.err (!%p279_p7)
}
 0x105   :  { %s286_s14 = smov 64   ;;  %s287_s15 = smov 4  }
 0x106   :  { %183 = dma.vmem_to_hbm [thread:$0]  %s178_s8, 256, %s356_s3, [#allocation3], %s286_s14, %s286_s14, %s287_s15  }
 0x107   :  { %283 = dma.done.wait [#allocation3], 256  }
 0x108   :  { %284 = vsyncadd [#allocation3], 4294967040 }
 0x109   :  { %187 = vsyncpa [#allocation3], 1 }

</bundles_post_ra>
